<compile_context>
chip_gen: v6e
topology: v6e:2x2x1
jax: 0.10.0
libtpu: 0.0.40
codegen_flags: <defaults>
</compile_context>

<pallas_src>
import jax
import jax.numpy as jnp
import numpy as np
from jax.experimental import pallas as pl
from jax.experimental.pallas import tpu as pltpu


def _residual_kernel(x_ref, w_ref, b_ref, o_ref):
    # x_ref/o_ref: (TN, C, TS)   w_ref: (C, C)   b_ref: (C, 1) f32
    w = w_ref[...]
    b = b_ref[...]
    # Static (small, <= 8-way) unrolled loop over the batch rows of the block;
    # each row is a clean (C,C) x (C,TS) MXU matmul with f32 accumulation.
    for i in range(x_ref.shape[0]):
        x = x_ref[i]                                                # (C, TS)
        h = jnp.dot(w, x, preferred_element_type=jnp.float32) + b   # (C, TS) f32
        # TODO(synk): PyTorch nn.GELU() defaults to the exact erf form; the
        # tanh approximation is used because it maps directly onto the EUP.
        h = jax.nn.gelu(h, approximate=True)
        # Residual add in the native dtype: avoids materializing a second
        # (C, TS) f32 copy of x in VMEM (identical numerics for f32 inputs,
        # halves add/store width for bf16 on v6e/v7x).
        o_ref[i] = h.astype(o_ref.dtype) + x


def _cdiv(a, b):
    return -(-a // b)


def _round_down(x, m):
    return (x // m) * m


def residual_forward(x_nchw, w, b, *, max_tile_s=8192, min_grid_steps=4,
                     max_tile_n=8):
    """Residual(fn)(x) with fn = GELU(Conv2d(C, C, 1)).

    x_nchw: (N, C, H, W)
    w:      (C_out, C_in) = (C, C)   (PyTorch conv weight[:, :, 0, 0])
    b:      (C,)
    """
    N, C, H, W = x_nchw.shape
    S = H * W
    itemsize = jnp.dtype(x_nchw.dtype).itemsize

    # --- generation-aware scoped-VMEM budget --------------------------------
    # v5e/v6e have 128 MiB physical VMEM, v7x only 64 MiB.  Request half of
    # physical as the scoped limit and size tiles against ~3/4 of that,
    # leaving headroom for compiler scratch and the resident weight buffers.
    try:
        phys_vmem = int(getattr(pltpu.get_tpu_info(), "vmem_capacity_bytes",
                                64 * 1024 * 1024))
    except Exception:  # e.g. query unavailable on this backend
        phys_vmem = 64 * 1024 * 1024
    vmem_limit = int(min(phys_vmem // 2, 64 * 1024 * 1024))

    # Per-lane-column footprint of one block:
    #   2x double-buffered x tile + 2x double-buffered out tile (native dtype)
    #   + f32 intermediates (h and gelu temporaries) ~= 12 B/elem.
    bytes_per_col = (4 * itemsize + 12) * C
    # Resident (constant index_map) weight + bias buffers are still
    # double-buffered by default.  (pl.Buffered(1) on those specs would
    # reclaim one copy on v7x; left off to keep lowering maximally portable.)
    resident_bytes = 2 * C * C * itemsize + 2 * _cdiv(C, 8) * 8 * 128 * 4
    budget = max(0, (vmem_limit * 3) // 4 - resident_bytes)
    budget_cols = max(1, budget // bytes_per_col)

    # --- tile sizing ---------------------------------------------------------
    if S <= 128:
        tile_s = S                       # full (short) spatial axis per block
    else:
        tile_s = min(_round_down(S, 128),              # lane-aligned, <= S
                     max_tile_s,
                     max(128, _round_down(budget_cols, 128)))
        # Keep >= min_grid_steps total steps so both v7x TensorCores get work
        # and the DMA pipeline has something to overlap.
        steps_per_image = _cdiv(min_grid_steps, N)
        if steps_per_image > 1:
            tile_s = min(tile_s,
                         max(128, _round_down(_cdiv(S, steps_per_image), 128)))
    n_s = _cdiv(S, tile_s)

    # Batch-block when the whole spatial extent fits in one tile (small S):
    # fattens the per-step DMA instead of issuing tiny per-image transfers.
    if n_s == 1:
        tile_n = max(1, min(N, budget_cols // max(1, tile_s)))
        tile_n = min(tile_n, max(1, _cdiv(N, min(min_grid_steps, N))))
        tile_n = min(tile_n, max_tile_n)   # bound the in-kernel unroll
    else:
        tile_n = 1

    grid = (_cdiv(N, tile_n), n_s)

    # NCHW -> (N, C, S): free reshape, no transpose / extra HBM round trip.
    x3 = x_nchw.reshape(N, C, S)
    # Keep the MXU on the fast activation-dtype path (and halve the resident
    # weight footprint) when activations are bf16.
    w_c = w.astype(x_nchw.dtype)
    # Tiny bias stays resident in VMEM as an f32 column.
    b_col = b.reshape(C, 1).astype(jnp.float32)

    cost = pl.CostEstimate(
        flops=2 * N * C * C * S + 10 * N * C * S,
        transcendentals=N * C * S,
        bytes_accessed=2 * N * C * S * itemsize + C * C * itemsize + C * 4,
    )

    out3 = pl.pallas_call(
        _residual_kernel,
        out_shape=jax.ShapeDtypeStruct((N, C, S), x_nchw.dtype),
        grid_spec=pltpu.PrefetchScalarGridSpec(
            num_scalar_prefetch=0,
            grid=grid,
            in_specs=[
                pl.BlockSpec((tile_n, C, tile_s), lambda i, j: (i, 0, j)),  # x
                pl.BlockSpec((C, C), lambda i, j: (0, 0)),   # weight (resident)
                pl.BlockSpec((C, 1), lambda i, j: (0, 0)),   # bias   (resident)
            ],
            out_specs=pl.BlockSpec((tile_n, C, tile_s), lambda i, j: (i, 0, j)),
        ),
        compiler_params=pltpu.CompilerParams(
            dimension_semantics=("parallel", "parallel"),
            vmem_limit_bytes=vmem_limit,
        ),
        cost_estimate=cost,
    )(x3, w_c, b_col)

    return out3.reshape(N, C, H, W)


def _reference(x_nchw, w, b):
    """Pure-JAX reference of fn(x) + x in NCHW."""
    N, C, H, W = x_nchw.shape
    x3 = x_nchw.reshape(N, C, H * W).astype(jnp.float32)
    h = jnp.einsum("ck,nks->ncs", w.astype(jnp.float32), x3) + b.reshape(1, C, 1)
    h = jax.nn.gelu(h, approximate=True)
    return (h + x3).reshape(N, C, H, W).astype(x_nchw.dtype)


if __name__ == "__main__":
    key = jax.random.PRNGKey(0)
    kx, kw, kb, kx2, kx3 = jax.random.split(key, 5)

    # deterministic fn parameters (Conv2d(C, C, 1): weight (C, C), bias (C,))
    N, C, H, W = 2, 4, 16, 16
    x = jax.random.normal(kx, (N, C, H, W), dtype=jnp.float32)
    w = jax.random.normal(kw, (C, C), dtype=jnp.float32) * 0.1
    b = jax.random.normal(kb, (C,), dtype=jnp.float32) * 0.1

    out = jax.block_until_ready(residual_forward(x, w, b))
    np.testing.assert_allclose(np.asarray(out), np.asarray(_reference(x, w, b)),
                               rtol=1e-5, atol=1e-5)

    # ragged spatial extent (H*W not a multiple of 128): partial-block path,
    # no jnp.pad / output-slice HBM round trip.
    x2 = jax.random.normal(kx2, (N, C, 10, 10), dtype=jnp.float32)
    out2 = jax.block_until_ready(residual_forward(x2, w, b))
    np.testing.assert_allclose(np.asarray(out2), np.asarray(_reference(x2, w, b)),
                               rtol=1e-5, atol=1e-5)

    # small spatial extent with more images: exercises the batch-blocked path.
    x3 = jax.random.normal(kx3, (8, C, 8, 8), dtype=jnp.float32)
    out3 = jax.block_until_ready(residual_forward(x3, w, b))
    np.testing.assert_allclose(np.asarray(out3), np.asarray(_reference(x3, w, b)),
                               rtol=1e-5, atol=1e-5)

    print("KERNEL_OK")
</pallas_src>

<mosaic_0001>
module attributes {stable_mosaic.version = 11 : i64} {
  func.func @_residual_kernel(%arg0: i32, %arg1: i32, %arg2: memref<1x4x128xf32, #tpu.memory_space<vmem>>, %arg3: memref<4x4xf32, #tpu.memory_space<vmem>>, %arg4: memref<4x1xf32, #tpu.memory_space<vmem>>, %arg5: memref<1x4x128xf32, #tpu.memory_space<vmem>>) attributes {dimension_semantics = [#tpu.dimension_semantics<parallel>, #tpu.dimension_semantics<parallel>], iteration_bounds = array<i64: 2, 2>, scalar_prefetch = 0 : i64, scratch_operands = 0 : i64, tpu.core_type = #tpu.core_type<tc>, window_params = [{transform_indices = @transform_0, window_bounds = array<i64: 1, 4, 128>}, {pipeline_mode = #tpu.pipeline_mode<synchronous>, transform_indices = @transform_1, window_bounds = array<i64: 4, 4>}, {pipeline_mode = #tpu.pipeline_mode<synchronous>, transform_indices = @transform_2, window_bounds = array<i64: 4, 1>}, {transform_indices = @transform_3, window_bounds = array<i64: 1, 4, 128>}]} {
    %c0 = arith.constant 0 : index
    %c0_0 = arith.constant 0 : index
    %0 = vector.load %arg3[%c0, %c0_0] : memref<4x4xf32, #tpu.memory_space<vmem>>, vector<4x4xf32>
    %c0_1 = arith.constant 0 : index
    %c0_2 = arith.constant 0 : index
    %1 = vector.load %arg4[%c0_1, %c0_2] : memref<4x1xf32, #tpu.memory_space<vmem>>, vector<4x1xf32>
    %c0_3 = arith.constant 0 : index
    %c0_4 = arith.constant 0 : index
    %c0_5 = arith.constant 0 : index
    %2 = vector.load %arg2[%c0_3, %c0_4, %c0_5] : memref<1x4x128xf32, #tpu.memory_space<vmem>>, vector<1x4x128xf32>
    %3 = vector.shape_cast %2 : vector<1x4x128xf32> to vector<4x128xf32>
    %cst = arith.constant dense<0.000000e+00> : vector<4x128xf32>
    %4 = tpu.matmul %0, %3, %cst {dimension_numbers = #tpu.dot_dimension_numbers<[1], [0], [0], [1], [0, 0, 1, 1], [], []>} : vector<4x4xf32>, vector<4x128xf32>, vector<4x128xf32> -> vector<4x128xf32>
    %5 = vector.broadcast %1 : vector<4x1xf32> to vector<4x128xf32>
    %6 = arith.addf %4, %5 : vector<4x128xf32>
    %7 = arith.mulf %6, %6 : vector<4x128xf32>
    %8 = arith.mulf %6, %7 : vector<4x128xf32>
    %cst_6 = arith.constant 4.471500e-02 : f32
    %9 = vector.broadcast %cst_6 : f32 to vector<4x128xf32>
    %10 = arith.mulf %9, %8 : vector<4x128xf32>
    %11 = arith.addf %6, %10 : vector<4x128xf32>
    %cst_7 = arith.constant 0.797884583 : f32
    %12 = vector.broadcast %cst_7 : f32 to vector<4x128xf32>
    %13 = arith.mulf %12, %11 : vector<4x128xf32>
    %14 = math.tanh %13 : vector<4x128xf32>
    %cst_8 = arith.constant 1.000000e+00 : f32
    %15 = vector.broadcast %cst_8 : f32 to vector<4x128xf32>
    %16 = arith.addf %15, %14 : vector<4x128xf32>
    %cst_9 = arith.constant 5.000000e-01 : f32
    %17 = vector.broadcast %cst_9 : f32 to vector<4x128xf32>
    %18 = arith.mulf %17, %16 : vector<4x128xf32>
    %19 = arith.mulf %6, %18 : vector<4x128xf32>
    %20 = arith.addf %19, %3 : vector<4x128xf32>
    %c0_10 = arith.constant 0 : index
    %c0_11 = arith.constant 0 : index
    %c0_12 = arith.constant 0 : index
    %21 = vector.load %arg5[%c0_10, %c0_11, %c0_12] : memref<1x4x128xf32, #tpu.memory_space<vmem>>, vector<1x4x128xf32>
    %22 = vector.shape_cast %21 : vector<1x4x128xf32> to vector<4x128xf32>
    %23 = vector.shape_cast %20 : vector<4x128xf32> to vector<1x4x128xf32>
    tpu.vector_store %arg5[%c0_10, %c0_11, %c0_12], %23 {strides = array<i32>} : memref<1x4x128xf32, #tpu.memory_space<vmem>>, vector<1x4x128xf32>,
    return
  }
  func.func @transform_0(%arg0: i32, %arg1: i32) -> (i32, i32, i32) {
    %c0_i32 = arith.constant 0 : i32
    %c0_i32_0 = arith.constant 0 : i32
    return %arg0, %c0_i32, %arg1 : i32, i32, i32
  }
  func.func @transform_1(%arg0: i32, %arg1: i32) -> (i32, i32) {
    %c0_i32 = arith.constant 0 : i32
    %c0_i32_0 = arith.constant 0 : i32
    %c0_i32_1 = arith.constant 0 : i32
    return %c0_i32, %c0_i32_0 : i32, i32
  }
  func.func @transform_2(%arg0: i32, %arg1: i32) -> (i32, i32) {
    %c0_i32 = arith.constant 0 : i32
    %c0_i32_0 = arith.constant 0 : i32
    %c0_i32_1 = arith.constant 0 : i32
    return %c0_i32, %c0_i32_0 : i32, i32
  }
  func.func @transform_3(%arg0: i32, %arg1: i32) -> (i32, i32, i32) {
    %c0_i32 = arith.constant 0 : i32
    %c0_i32_0 = arith.constant 0 : i32
    return %arg0, %c0_i32, %arg1 : i32, i32, i32
  }
}

</mosaic_0001>

<bundles_post_ra>
// kernel: tpu_custom_call.1
= control target key start
LH: loop header
LB: loop body
LE: loop exit
PB: predicated region body
PF: predicated region fallthrough
CT: control target
= control target key end

     0   :  { %8 = vsyncpa [#allocation3], 0  ;;  %s827_s0 = inlined_call_operand.hbm [shape: f32[2,4,256], index: 0, kind: input, shape index: {}]   ;;  %s828_s1 = inlined_call_operand.vmem [shape: f32[4,4], index: 1, kind: input, shape index: {}]   ;;  %s829_s2 = inlined_call_operand.vmem [shape: f32[4,1], index: 2, kind: input, shape index: {}]   ;;  %s830_s3 = inlined_call_operand.hbm [shape: f32[2,4,256], index: 3, kind: output, shape index: {}]  }
   0x1   :  { %10 = vsyncpa [#allocation3 + $0x1], 0 }
   0x2   :  { %11 = vsyncpa [#allocation4], 0 }
   0x3   :  { %13 = vsyncpa [#allocation4 + $0x1], 0  ;;  %s661_s12 = smov 0   ;;  %s663_s13 = smov 0  }
   0x4   :  { %s665_s14 = smov 0   ;;  %s667_s15 = smov 0  }
   0x5   :  { %s669_s16 = smov 0   ;;  %s671_s17 = smov 0  }
   0x6   :  { %s673_s18 = smov 0   ;;  %s675_s19 = smov 0  }
   0x7 LB: > { %s402_s20 = sadd.s32 4294967295, %s634_s19   ;;  %s403_s21 = sadd.s32 4294967294, %s634_s19   ;;  %s634_s19 = sphi %s675_s19, %s19_s19   ;;  %s630_s18 = sphi %s673_s18, %s846_s18   ;;  %s626_s17 = sphi %s671_s17, %s845_s17   ;;  %s622_s16 = sphi %s669_s16, %s844_s16   ;;  %s618_s15 = sphi %s667_s15, %s843_s15   ;;  %s614_s14 = sphi %s665_s14, %s842_s14   ;;  %s610_s13 = sphi %s663_s13, %s841_s13   ;;  %s606_s12 = sphi %s661_s12, %s840_s12  }
   0x8   : > { %s28_s22 = sadd.s32 1, %s626_s17  ;;  %s31_s23 = sadd.s32 1, %s630_s18 }
   0x9   : > { %p29_p0 = scmp.ge.s32.totalorder %s28_s22, 2  ;;  %s40_s24 = sadd.s32 1, %s614_s14 }
   0xa   : > { %p47_p1 = scmp.ne.s32.totalorder %s614_s14, %s610_s13  ;;  %p48_p2 = scmp.eq.s32.totalorder %s634_s19, 0 }
   0xb   : > { %s848_s22 = smov (%p29_p0, %s28_s22), 0  ;;  %s850_s23 = smov (!%p29_p0, %s31_s23), %s630_s18 }
   0xc   : > { %s36_s25 = ssub.s32 %s626_s17, %s848_s22  ;;  %p714_p3 = por %p48_p2, %p47_p1 }
   0xd   : > { %p33_p4 = scmp.ge.s32.totalorder %s850_s23, 2  ;;  %p53_p5 = scmp.ne.s32.totalorder %s610_s13, %s606_s12 }
   0xe   : > { %p54_p6 = scmp.eq.s32.totalorder %s402_s20, 0  ;;  %p121_p7 = scmp.eq.s32.totalorder %s402_s20, 3 }
   0xf   : > { %s852_s23 = smov (%p33_p4, %s850_s23), 0  ;;  %p127_p10 = scmp.eq.s32.totalorder %s403_s21, 3 }
  0x10   : > { %833 = sst [smem:[#allocation8_spill]] %s852_s23  ;;  %p722_p8 = por %p54_p6, %p53_p5 }
  0x11   : > { %p726_p9 = por %p121_p7, %p47_p1  ;;  %s35_s29 = ssub.s32 %s630_s18, %s852_s23 }
  0x12   : > { %s37_s30 = sor.u32 %s36_s25, %s35_s29  ;;  %p732_p12 = por %p127_p10, %p53_p5 }
  0x13   : > { %p38_p11 = scmp.eq.s32.totalorder %s37_s30, 0  ;;  %p438_p13 = scmp.lt.s32.totalorder %s634_s19, 4 }
  0x14   : > { %s836_s4 = scalar_select %p732_p12, 1, 0 }
  0x15   : > { %s153_s5 = sand.u32 1, %s614_s14   ;;  %s407_s8 = sshll.u32 %s630_s18, 1 }
  0x16   : > { %s739_s6 = scalar_select %p38_p11, %s614_s14, %s40_s24  }
  0x17   : > { %s406_s7 = sshll.u32 %s153_s5, 2  ;;  %s162_s9 = sadd.s32 %s626_s17, %s407_s8 }
  0x18   : > { %s157_s10 = scalar_lea.vmem [#allocation2], %s406_s7  ;;  %s408_s20 = sshll.u32 %s162_s9, 6 }
  0x19   : > { %s166_s11 = sshll.u32 %s157_s10, 4  ;;  %s164_s25 = scalar_lea.hbm %s827_s0, %s408_s20  ;;  %s167_s11 = int_to_ptr.vmem [resolvable:$true] %s166_s11 }
  0x1a   : > { %p748_p0 = pnand %p438_p13, %p714_p3  ;;  %p409_p1 = scmp.ge.s32.totalorder %s634_s19, 1 }
  0x1b   : > { %p171_p2 = scmp.lt.s32.totalorder %s634_s19, 5  ;;  %s154_s24 = scalar_lea.sflag [#allocation3], %s153_s5 }
  0x1c   : > { %p512_p4 = pneg %p748_p0  ;;  %s523_s30 = scalar_lea.vmem %s167_s11, 64 }
  0x1d   : > { %p524_p5 = scmp.ne.s32.totalorder %s167_s11, %s523_s30  ;;  %s636_s7 = smov [#allocation2]  }
  0x1e   : > { %s528_s8 = sshll.u32 %s636_s7, 4  ;;  %s529_s8 = int_to_ptr.vmem [resolvable:$false] %s528_s8 }
  0x1f   : > { %p526_p6 = pnand %p524_p5, %p512_p4  ;;  %s530_s23 = scalar_lea.vmem %s529_s8, 128 }
  0x20   : > { %p531_p10 = scmp.lt.s32.totalorder %s167_s11, %s529_s8  ;;  %p532_p11 = scmp.lt.s32.totalorder %s530_s23, %s523_s30 }
  0x21   : > { %p527_p7 = pneg %p526_p6 }
  0x22   : > { %p533_p3 = por %p532_p11, %p531_p10 }
  0x24   : > { %p534_p13 = pnand %p533_p3, %p527_p7 }
  0x26   : > { %537 = shalt.err (!%p534_p13)
}
  0x27   : > { %433 = dma.hbm_to_vmem [thread:$0]  (!%p748_p0), %s164_s25, 64, %s167_s11, %s154_s24  }
  0x28   : > { %p172_p12 = pnand %p409_p1, %p171_p2 }
  0x29   : > { %s763_s26 = sand.u32 (!%p172_p12), 1, %s610_s13  }
  0x2a   : > { %175 = sbr.rel (%p172_p12) target bundleno = 291 (0x123), region = 32  ;;  %s410_s5 = sshll.u32 (!%p172_p12), %s763_s26, 2 }
  0x2b   : > { %s178_s9 = scalar_lea.sflag (!%p172_p12), [#allocation3], %s763_s26  ;;  %s181_s10 = scalar_lea.vmem (!%p172_p12), [#allocation2], %s410_s5 }
  0x2f   : > { %597 = dma.done.wait (%p722_p8), %s178_s9, 64  }
  0x30   : > { %599 = vsyncadd (%p722_p8), %s178_s9, 4294967232  ;;  %v637_v0 = vmov 0.0   ;;  %vm638_vm0 = vmmov 0   ;;  %v639_v1 = vmov 0   ;;  %vm216_vm1 = vcmask 1043456   ;;  %s415_s27 = sshll.u32 %s622_s16, 1 }
  0x31   : > { %421 = vmatprep.subr.mxu0 %v637_v0  ;;  %423 = vmatprep.mubr.msk.f32.mxu0 %vm638_vm0, %v637_v0  ;;  %vm212_vm2 = vcmask 31744   ;;  %v206_v2 = vld [vmem:[%s181_s10] sm:$0xf]  ;;  %s313_s29 = sadd.s32 %s618_s15, %s415_s27  ;;  %s203_s30 = scalar_lea.vmem [#allocation5], %s410_s5 }
  0x32   : > { %507 = vset.pattern.permute.xlu0 %v639_v1  ;;  %v204_v3 = vld [vmem:[%s828_s1] sm:$0xf]  ;;  %422 = vmatpush3.msk.msra.mxu0 %vm216_vm1, %v206_v2  ;;  %s416_s24 = sshll.u32 %s313_s29, 6  ;;  %s317_s7 = sshll.u32 %s203_s30, 4  ;;  %s318_s7 = int_to_ptr.vmem [resolvable:$true] %s317_s7 }
  0x33   : > { %v205_v4 = vld [vmem:[%s829_s2] sm:$0xf]  ;;  %424 = vmatmul.mubr.msk.f32.vlgmr.msra.gmra.mxu0 %vm212_vm2, %v204_v3  ;;  %s315_s9 = scalar_lea.hbm %s830_s3, %s416_s24  ;;  %s302_s10 = scalar_lea.sflag [#allocation4], %s763_s26 }
  0x34   : > { %209 = vperm.xlu0 %507, %v205_v4   ;;  %s538_s11 = scalar_lea.vmem %s318_s7, 64  ;;  %s640_s15 = smov [#allocation5]  }
  0x35   : > { %p539_p8 = scmp.ne.s32.totalorder %s318_s7, %s538_s11  ;;  %s542_s16 = sshll.u32 %s640_s15, 4  ;;  %s543_s16 = int_to_ptr.vmem [resolvable:$false] %s542_s16 }
  0x36   : > { %s544_s20 = scalar_lea.vmem %s543_s16, 128  ;;  %p545_p1 = scmp.lt.s32.totalorder %s318_s7, %s543_s16 }
  0x37   : > { %p540_p12 = pnand %p539_p8, %p726_p9  ;;  %p546_p2 = scmp.lt.s32.totalorder %s544_s20, %s538_s11 }
  0x39   : > { %p541_p0 = pneg %p540_p12  ;;  %p547_p4 = por %p546_p2, %p545_p1 }
  0x3b   : > { %p548_p5 = pnand %p547_p4, %p541_p0 }
  0xaf   : > { %v210_v5 = vpop.permute.xlu0 %209 }
  0xf3   : > { %v286_v6 = vpop.f32.mrf.mxu0 }
  0xf4   : > { %v287_v7 = vadd.f32 %v286_v6, %v210_v5 }
  0xf5   : > { %v425_v8 = vpop.f32.mrf.mxu0 }
  0xf6   : > { %v290_v9 = vmul.f32 %v287_v7, %v287_v7 }
  0xf8   : > { %v291_v10 = vmul.f32 %v290_v9, %v287_v7 }
  0xfa   : > { %v292_v11 = vmul.f32 0.044715, %v291_v10 }
  0xfc   : > { %v293_v12 = vadd.f32 %v292_v11, %v287_v7 }
  0xfe   : > { %v294_v13 = vmul.f32 0.7978846, %v293_v12 }
 0x100   : > { %508 = vtanh.f32 %v294_v13 }
 0x10d   : > { %v509_v14 = vpop.eup %508 }
 0x10e   : > { %v296_v15 = vadd.f32 1.0, %v509_v14 }
 0x110   : > { %v297_v16 = vmul.f32 0.5, %v296_v15 }
 0x112   : > { %v298_v17 = vmul.f32 %v297_v16, %v287_v7 }
 0x114   : > { %v299_v18 = vadd.f32 %v298_v17, %v206_v2 }
 0x116   : > { %300 = vst [vmem:[%s203_s30] sm:$0xf] %v299_v18 }
 0x117   : > { %551 = shalt.err (!%p548_p5)
}
 0x118   : > { %s552_s5 = scalar_lea.hbm %s315_s9, 64  ;;  %s556_s25 = scalar_lea.hbm %s830_s3, 256 }
 0x119   : > { %p553_p6 = scmp.ne.s32.totalorder %s315_s9, %s552_s5  ;;  %p557_p11 = scmp.lt.s32.totalorder %s315_s9, %s830_s3 }
 0x11a   : > { %p558_p3 = scmp.lt.s32.totalorder %s556_s25, %s552_s5 }
 0x11b   : > { %p554_p7 = pnand %p553_p6, %p726_p9 }
 0x11c   : > { %p559_p13 = por %p558_p3, %p557_p11 }
 0x11d   : > { %p555_p10 = pneg %p554_p7 }
 0x11f   : > { %p560_p8 = pnand %p559_p13, %p555_p10 }
 0x121   : > { %563 = shalt.err (!%p560_p8)
}
 0x122   : > { %428 = dma.vmem_to_hbm [thread:$0]  (%p726_p9), %s318_s7, 64, %s315_s9, %s302_s10  }
 0x123 PF: > { %p439_p12 = scmp.ge.s32.totalorder %s634_s19, 2  ;;  %s329_s24 = sand.u32 1, %s606_s12  }
 0x124   : > { %p838_p0 = scmp.ne.s32.totalorder %s836_s4, 0  ;;  %s330_s30 = scalar_lea.sflag [#allocation4], %s329_s24 }
 0x126   : > { %p435_p1 = pnand %p439_p12, %p838_p0 }
 0x128   : > { %p436_p2 = pneg %p435_p1 }
 0x12a   : > { %601 = dma.done.wait (%p436_p2), %s330_s30, 64  }
 0x12b   : > { %603 = vsyncadd (%p436_p2), %s330_s30, 4294967232  ;;  %s19_s19 = sadd.s32 1, %s634_s19   ;;  %s839_s28 = sld [smem:[#allocation8_spill]] }
 0x12c   : > { %p16_p4 = scmp.ge.s32.totalorder %s19_s19, 6   ;;  %s840_s12 = smov %s610_s13 }
 0x12d   : > { %s841_s13 = smov %s614_s14  ;;  %s842_s14 = smov %s739_s6 }
 0x12e   : > { %s843_s15 = smov %s626_s17  ;;  %s844_s16 = smov %s630_s18 }
 0x12f   : > { %s845_s17 = smov %s848_s22  ;;  %18 = sbr.rel (!%p16_p4) target bundleno = 7 (0x7), region = 77 }
 0x131   : > { %s846_s18 = smov %s839_s28 }
 0x134   :  { %335 = vsyncpa [#allocation3], 1 }
 0x135   :  { %337 = vsyncpa [#allocation3 + $0x1], 1 }
 0x136   :  { %338 = vsyncpa [#allocation4], 1 }
 0x137   :  { %340 = vsyncpa [#allocation4 + $0x1], 1 }

</bundles_post_ra>
